<compile_context>
chip_gen: v7x
topology: tpu7x:2x2x1
jax: 0.10.0
libtpu: 0.0.40
codegen_flags: <defaults>
</compile_context>

<pallas_src>
import functools
import math

import jax
import jax.numpy as jnp
from jax.experimental import pallas as pl
from jax.experimental.pallas import tpu as pltpu


# ----------------------------- tuning knobs ----------------------------------

_TILE_VMEM_BUDGET = 24 * 1024 * 1024   # target double-buffered working set
_VMEM_LIMIT_BYTES = 48 * 1024 * 1024   # fits v7x (64 MiB) and v5e/v6e (128 MiB)


def _choose_seq_tile(seq_len: int, per_row_bytes: int) -> int:
    """Pick a sequence tile: big enough for HBM roofline, small enough for VMEM."""
    ts = _TILE_VMEM_BUDGET // max(per_row_bytes, 1)
    # Keep >= ~4 grid steps on long sequences so the DMA pipeline overlaps,
    # but never shrink below the measured 256+-row sweet spot.
    ts = min(ts, max(256, pl.cdiv(seq_len, 4)))
    if ts >= seq_len:
        return seq_len
    # 32-row alignment satisfies sublane tiling for both f32 (8) and uint8 (32).
    return max(32, (ts // 32) * 32)


# ----------------------------- kernels ---------------------------------------

def _pe_add_kernel(x_ref, pe_ref, o_ref, *, batch):
    # x_ref: (ts, B*D), pe_ref: (ts, D).  Broadcast PE over batch by tiling
    # along the lane axis (XLU work; free under a mem-bound kernel).
    o_ref[...] = x_ref[...] + jnp.tile(pe_ref[...], (1, batch))


def _pe_add_dropout_kernel(x_ref, pe_ref, m_ref, o_ref, *, batch, scale):
    # Inverted dropout using a precomputed uint8 keep-mask (1 = keep).
    y = x_ref[...] + jnp.tile(pe_ref[...], (1, batch))
    keep = m_ref[...] > 0
    o_ref[...] = jnp.where(keep, y * jnp.asarray(scale, y.dtype),
                           jnp.zeros_like(y))


# ----------------------------- parameter setup -------------------------------

def make_positional_encoding_table(d_model: int, max_len: int = 5000,
                                   dtype=jnp.float32):
    """Deterministic buffer identical to the PyTorch __init__ (shape (L, 1, D))."""
    position = jnp.arange(max_len, dtype=jnp.float32)[:, None]            # (L, 1)
    div_term = jnp.exp(jnp.arange(0, d_model, 2, dtype=jnp.float32)
                       * (-math.log(10000.0) / d_model))                  # (D/2,)
    pe = jnp.zeros((max_len, 1, d_model), dtype=jnp.float32)
    pe = pe.at[:, 0, 0::2].set(jnp.sin(position * div_term))
    pe = pe.at[:, 0, 1::2].set(jnp.cos(position * div_term))
    return pe.astype(dtype)


# ----------------------------- wrapper ----------------------------------------

def positional_encoding(x, pe, *, dropout_rate: float = 0.1,
                        deterministic: bool = True, rng=None,
                        seq_tile: int | None = None, donate_x: bool = False):
    """Forward pass of PositionalEncoding.

    x:  (seq_len, batch, d_model)
    pe: (max_len, 1, d_model) buffer from make_positional_encoding_table.
    deterministic=True corresponds to module.eval() (dropout is identity).
    rng: jax PRNGKey, required when deterministic=False and dropout_rate > 0
         (pass a fresh key per call/layer to avoid mask reuse).
    seq_tile: optional override; should be a multiple of 32 or >= seq_len.
    donate_x: alias x's HBM buffer to the output (only if x is dead afterwards).
    """
    S, B, D = x.shape
    BD = B * D
    if pe.shape[0] < S:
        raise ValueError("pe table shorter than sequence length")
    if not (0.0 <= dropout_rate <= 1.0):
        raise ValueError("dropout_rate must be in [0, 1]")
    if pe.dtype != x.dtype:
        pe = pe.astype(x.dtype)

    use_dropout = (not deterministic) and dropout_rate > 0.0
    if use_dropout and dropout_rate >= 1.0:
        return jnp.zeros_like(x)          # torch Dropout(p=1.0) zeroes everything

    # Lane/sublane-dense 2-D views (pure layout plumbing; no extra compute).
    x2d = x.reshape(S, BD)
    pe2d = pe.reshape(pe.shape[0], D)     # squeeze the broadcast batch dim

    itemsize = jnp.dtype(x.dtype).itemsize
    mask_row_bytes = BD if use_dropout else 0
    # Double-buffered streams per row: x in, out, (mask), pe.
    per_row = 2 * (2 * BD * itemsize + mask_row_bytes + D * itemsize)
    ts = _choose_seq_tile(S, per_row) if seq_tile is None else min(seq_tile, S)
    grid = (pl.cdiv(S, ts),)

    x_spec = pl.BlockSpec((ts, BD), lambda i: (i, 0))
    pe_spec = pl.BlockSpec((ts, D), lambda i: (i, 0))   # windows pe directly
    out_spec = pl.BlockSpec((ts, BD), lambda i: (i, 0))
    out_shape = jax.ShapeDtypeStruct((S, BD), x.dtype)

    compiler_params = pltpu.CompilerParams(
        dimension_semantics=("parallel",),
        vmem_limit_bytes=_VMEM_LIMIT_BYTES)
    aliases = {0: 0} if donate_x else {}

    if not use_dropout:
        cost = pl.CostEstimate(
            flops=S * BD, transcendentals=0,
            bytes_accessed=2 * S * BD * itemsize + S * D * itemsize)
        out2d = pl.pallas_call(
            functools.partial(_pe_add_kernel, batch=B),
            out_shape=out_shape,
            grid_spec=pltpu.PrefetchScalarGridSpec(
                num_scalar_prefetch=0, grid=grid,
                in_specs=[x_spec, pe_spec], out_specs=out_spec),
            compiler_params=compiler_params,
            cost_estimate=cost,
            input_output_aliases=aliases,
        )(x2d, pe2d)
        return out2d.reshape(S, B, D)

    if rng is None:
        raise ValueError("rng key required when deterministic=False and "
                         "dropout_rate > 0")
    keep = jax.random.bernoulli(rng, p=1.0 - float(dropout_rate), shape=(S, BD))
    mask = keep.astype(jnp.uint8)
    m_spec = pl.BlockSpec((ts, BD), lambda i: (i, 0))
    scale = 1.0 / (1.0 - float(dropout_rate))
    cost = pl.CostEstimate(
        flops=2 * S * BD, transcendentals=0,
        bytes_accessed=2 * S * BD * itemsize + S * D * itemsize + S * BD)
    out2d = pl.pallas_call(
        functools.partial(_pe_add_dropout_kernel, batch=B, scale=scale),
        out_shape=out_shape,
        grid_spec=pltpu.PrefetchScalarGridSpec(
            num_scalar_prefetch=0, grid=grid,
            in_specs=[x_spec, pe_spec, m_spec], out_specs=out_spec),
        compiler_params=compiler_params,
        cost_estimate=cost,
        input_output_aliases=aliases,
    )(x2d, pe2d, mask)
    return out2d.reshape(S, B, D)


# ----------------------------- main -------------------------------------------

if __name__ == "__main__":
    d_model = 32
    seq_len = 8
    batch = 2
    max_len = 64
    dropout_rate = 0.1

    key = jax.random.PRNGKey(0)
    kx, kmask = jax.random.split(key)
    x = jax.random.normal(kx, (seq_len, batch, d_model), dtype=jnp.float32)
    pe = make_positional_encoding_table(d_model, max_len=max_len)

    ref = x + pe[:seq_len]

    # Eval-mode forward (dropout is identity) — check against pure-JAX reference.
    out_eval = positional_encoding(x, pe, dropout_rate=dropout_rate,
                                   deterministic=True)
    out_eval = jax.block_until_ready(out_eval)
    assert out_eval.shape == x.shape and out_eval.dtype == x.dtype
    assert jnp.allclose(out_eval, ref, atol=1e-6, rtol=1e-6), "eval mismatch"

    # Training-mode forward: every element must be either 0 (dropped) or
    # ref / (1 - p) (kept, rescaled).
    out_train = positional_encoding(x, pe, dropout_rate=dropout_rate,
                                    deterministic=False, rng=kmask)
    out_train = jax.block_until_ready(out_train)
    assert out_train.shape == x.shape and out_train.dtype == x.dtype
    scale = 1.0 / (1.0 - dropout_rate)
    ok = (jnp.isclose(out_train, 0.0, atol=1e-6)
          | jnp.isclose(out_train, ref * scale, atol=1e-5, rtol=1e-5))
    assert bool(jnp.all(ok)), "dropout mismatch"

    print("KERNEL_OK")
</pallas_src>

<mosaic_0001>
module attributes {stable_mosaic.version = 11 : i64} {
  func.func @_pe_add_kernel(%arg0: i32, %arg1: memref<8x64xf32, #tpu.memory_space<vmem>>, %arg2: memref<8x32xf32, #tpu.memory_space<vmem>>, %arg3: memref<8x64xf32, #tpu.memory_space<vmem>>) attributes {dimension_semantics = [#tpu.dimension_semantics<parallel>], iteration_bounds = array<i64: 1>, scalar_prefetch = 0 : i64, scratch_operands = 0 : i64, tpu.core_type = #tpu.core_type<tc>, window_params = [{transform_indices = @transform_0, window_bounds = array<i64: 8, 64>}, {transform_indices = @transform_1, window_bounds = array<i64: 8, 32>}, {transform_indices = @transform_2, window_bounds = array<i64: 8, 64>}]} {
    %c0 = arith.constant 0 : index
    %c0_0 = arith.constant 0 : index
    %0 = vector.load %arg1[%c0, %c0_0] : memref<8x64xf32, #tpu.memory_space<vmem>>, vector<8x64xf32>
    %c0_1 = arith.constant 0 : index
    %c0_2 = arith.constant 0 : index
    %1 = vector.load %arg2[%c0_1, %c0_2] : memref<8x32xf32, #tpu.memory_space<vmem>>, vector<8x32xf32>
    %2 = tpu.concatenate %1, %1 in 1 : vector<8x32xf32>, vector<8x32xf32> -> vector<8x64xf32>
    %3 = arith.addf %0, %2 : vector<8x64xf32>
    %c0_3 = arith.constant 0 : index
    %c0_4 = arith.constant 0 : index
    %4 = vector.load %arg3[%c0_3, %c0_4] : memref<8x64xf32, #tpu.memory_space<vmem>>, vector<8x64xf32>
    tpu.vector_store %arg3[%c0_3, %c0_4], %3 {strides = array<i32>} : memref<8x64xf32, #tpu.memory_space<vmem>>, vector<8x64xf32>,
    return
  }
  func.func @transform_0(%arg0: i32) -> (i32, i32) {
    %c0_i32 = arith.constant 0 : i32
    %c0_i32_0 = arith.constant 0 : i32
    return %arg0, %c0_i32 : i32, i32
  }
  func.func @transform_1(%arg0: i32) -> (i32, i32) {
    %c0_i32 = arith.constant 0 : i32
    %c0_i32_0 = arith.constant 0 : i32
    return %arg0, %c0_i32 : i32, i32
  }
  func.func @transform_2(%arg0: i32) -> (i32, i32) {
    %c0_i32 = arith.constant 0 : i32
    %c0_i32_0 = arith.constant 0 : i32
    return %arg0, %c0_i32 : i32, i32
  }
}

</mosaic_0001>

<bundles_post_ra>
// kernel: tpu_custom_call.1
= control target key start
LH: loop header
LB: loop body
LE: loop exit
PB: predicated region body
PF: predicated region fallthrough
CT: control target
= control target key end

     0   :  { %s98_s0 = inlined_call_operand.vmem [shape: f32[8,64], index: 0, kind: input, shape index: {}]   ;;  %s99_s1 = inlined_call_operand.vmem [shape: f32[64,32], index: 1, kind: input, shape index: {}]   ;;  %s100_s2 = inlined_call_operand.hbm [shape: f32[8,64], index: 2, kind: output, shape index: {}]  }
   0x1   :  { %v13_v0 = vld [vmem:[%s99_s1] sm:$0xff] }
   0x2   :  { %7 = vsyncpa [#allocation3], 0  ;;  %s63_s11 = smov 32   ;;  %vm18_vm0 = vcmask 261120   ;;  %v12_v1 = vld [vmem:[%s98_s0] sm:$0xff]  ;;  %s64_s14 = smov [#allocation2]  }
   0x3   :  { %15 = vrot.lane.b32.xlu0 %v13_v0, %s63_s11  ;;  %s29_s15 = sshll.u32 %s64_s14, 4  ;;  %vm21_vm1 = vcmask 523264   ;;  %s30_s15 = int_to_ptr.vmem [resolvable:$true] %s29_s15 }
   0x4   :  { %s39_s16 = scalar_lea.vmem %s30_s15, 128  ;;  %p44_p1 = scmp.lt.s32.totalorder %s30_s15, %s30_s15 }
   0x5   :  { %p40_p0 = scmp.ne.s32.totalorder %s30_s15, %s39_s16  ;;  %p45_p2 = scmp.lt.s32.totalorder %s39_s16, %s39_s16 }
   0x7   :  { %p46_p3 = por %p45_p2, %p44_p1 }
   0x9   :  { %p47_p4 = pnand %p46_p3, %p40_p0 }
  0x75   :  { %v16_v2 = vpop.permute.xlu0 %15 }
  0x76   :  { %v19_v3 = vsel %vm18_vm0, %v13_v0, %v16_v2 }
  0x77   :  { %v20_v4 = vadd.f32 %v19_v3, %v12_v1 }
  0x79   :  { %22 = vst.msk [vmem:[#allocation2] sm:$0xff] %vm21_vm1, %v20_v4 }
  0x7a   :  { %50 = shalt.err (!%p47_p4)
}
  0x7b   :  { %s51_s18 = scalar_lea.hbm %s100_s2, 128 }
  0x7c   :  { %p52_p5 = scmp.ne.s32.totalorder %s100_s2, %s51_s18  ;;  %p55_p6 = scmp.lt.u32.totalorder %s51_s18, %s100_s2 }
  0x7e   :  { %p57_p7 = pnand %p55_p6, %p52_p5 }
  0x80   :  { %60 = shalt.err (!%p57_p7)
}
  0x81   :  { %32 = dma.vmem_to_hbm [thread:$0]  %s30_s15, 128, %s100_s2, [#allocation3]  }
  0x82   :  { %61 = dma.done.wait [#allocation3], 128  }
  0x83   :  { %62 = vsyncadd [#allocation3], 4294967168 }
  0x84   :  { %36 = vsyncpa [#allocation3], 1 }

</bundles_post_ra>
